<compile_context>
chip_gen: v7x
topology: tpu7x:2x2x1
jax: 0.10.0
libtpu: 0.0.40
codegen_flags: <defaults>
</compile_context>

<pallas_src>
import functools

import jax
import jax.numpy as jnp
from jax.experimental import pallas as pl
from jax.experimental.pallas import tpu as pltpu


def _round_up(x: int, m: int) -> int:
    return ((x + m - 1) // m) * m


def _cdiv(a: int, b: int) -> int:
    return -(-a // b)


def _vmem_limit_bytes() -> int:
    """Chip-aware scoped-VMEM budget: 64 MiB on 128-MiB parts, ~48 MiB on v7x."""
    try:
        cap = int(pltpu.get_tpu_info().vmem_capacity_bytes)
        return max(32 << 20, min(64 << 20, cap - (16 << 20)))
    except Exception:
        return 32 << 20


def splade_pool_kernel(emb_ref, mask_ref, out_ref, *, chunk: int):
    # emb_ref:  (TB, TS, TD) block of token embeddings (input dtype)
    # mask_ref: (TB, TS, 1)  block of the (zero-padded) attention mask
    # out_ref:  (TB, TD)     pooled output tile; resident across the S grid axis
    s = pl.program_id(2)

    @pl.when(s == 0)
    def _init():
        # Values are >= 0 (relu, masked to 0), so 0 is the max identity.
        out_ref[...] = jnp.zeros_like(out_ref)

    ts = emb_ref.shape[1]
    acc = out_ref[...]
    # Chunked reduction with static sublane slices: the masked intermediate stays
    # at (TB, chunk, TD) instead of the full (TB, TS, TD) block.
    for off in range(0, ts, chunk):
        x = emb_ref[:, off:off + chunk, :]           # (TB, chunk, TD)
        m = mask_ref[:, off:off + chunk, :]          # (TB, chunk, 1)
        relu_x = jnp.maximum(x, 0)
        # select (not multiply): NaN-safe against undefined tail rows of partial
        # S blocks (their mask entries are zero-padded in the wrapper).
        v = jnp.where(m > 0, relu_x, 0)
        acc = jnp.maximum(acc, jnp.max(v, axis=1))
    out_ref[...] = acc

    @pl.when(s == pl.num_programs(2) - 1)
    def _finish():
        # log1p only on the reduced B*D values, in f32.
        out_ref[...] = jnp.log1p(out_ref[...].astype(jnp.float32)).astype(out_ref.dtype)


def splade_pooling(token_embeddings: jax.Array,
                   attention_mask: jax.Array,
                   *,
                   tb: int = 8,
                   ts: int = 256,
                   td: int = 1024) -> jax.Array:
    """token_embeddings: (B, S, D); attention_mask: (B, S) binary -> (B, D)."""
    B, S, D = token_embeddings.shape
    dtype = token_embeddings.dtype

    # Tile sizes respecting the (8, 128) rule (or full-dim equality for small dims).
    TB = min(tb, B)
    TS = min(ts, _round_up(S, 8))                  # multiple of 8 (sublane axis)
    TD = min(td, _round_up(D, 128))                # multiple of 128 (lane axis)

    # v7x megacore: make sure the parallel (b, d) grid has >= 2 tiles when possible.
    if B <= TB and _cdiv(D, TD) == 1 and D >= 256:
        TD = _round_up(_cdiv(D, 2), 128)

    grid = (_cdiv(B, TB), _cdiv(D, TD), _cdiv(S, TS))

    # In-block reduction chunk (static, multiple of 8, divides TS).
    chunk = TS
    for c in (64, 32, 16, 8):
        if TS % c == 0:
            chunk = c
            break

    # Only the tiny mask is padded (zeros), never the big embedding tensor.
    Bp = grid[0] * TB
    Sp = grid[2] * TS
    mask3 = attention_mask.astype(dtype)[:, :, None]
    if (Bp, Sp) != (B, S):
        mask3 = jnp.pad(mask3, ((0, Bp - B), (0, Sp - S), (0, 0)))

    itemsize = jnp.dtype(dtype).itemsize
    kernel = functools.partial(splade_pool_kernel, chunk=chunk)

    return pl.pallas_call(
        kernel,
        out_shape=jax.ShapeDtypeStruct((B, D), dtype),
        grid_spec=pltpu.PrefetchScalarGridSpec(
            num_scalar_prefetch=0,
            grid=grid,
            in_specs=[
                pl.BlockSpec((TB, TS, TD), lambda b, d, s: (b, s, d)),
                pl.BlockSpec((TB, TS, 1), lambda b, d, s: (b, s, 0)),
            ],
            # Output block index ignores the S (reduction) axis -> resident in VMEM
            # across the running-max reduction; partial edge blocks are clipped on
            # write-back so no output padding/slicing is needed.
            out_specs=pl.BlockSpec((TB, TD), lambda b, d, s: (b, d)),
        ),
        compiler_params=pltpu.CompilerParams(
            dimension_semantics=("parallel", "parallel", "arbitrary"),
            vmem_limit_bytes=_vmem_limit_bytes(),
        ),
        cost_estimate=pl.CostEstimate(
            flops=3 * B * S * D,                     # relu + select + max
            transcendentals=B * D,                   # log1p after the reduction
            bytes_accessed=(B * S * D + grid[1] * Bp * Sp + B * D) * itemsize,
        ),
    )(token_embeddings, mask3)


def splade_pooling_ref(token_embeddings, attention_mask):
    act = jnp.log1p(jnp.maximum(token_embeddings, 0.0))
    act = act * attention_mask.astype(token_embeddings.dtype)[..., None]
    return jnp.max(act, axis=1)


if __name__ == "__main__":
    key = jax.random.PRNGKey(0)
    k_emb, k_mask, k_emb2, k_mask2 = jax.random.split(key, 4)

    # --- primary small test (module spec: word_embedding_dimension = 128) ---
    B, S, D = 2, 8, 128
    token_embeddings = jax.random.normal(k_emb, (B, S, D), dtype=jnp.float32)
    # binary mask: first row fully valid, second row has trailing padding
    attention_mask = jnp.concatenate(
        [jnp.ones((1, S), dtype=jnp.float32),
         jnp.concatenate([jnp.ones((1, S - 3)), jnp.zeros((1, 3))], axis=1)],
        axis=0,
    )

    out = jax.block_until_ready(splade_pooling(token_embeddings, attention_mask))
    ref = splade_pooling_ref(token_embeddings, attention_mask)
    assert out.shape == (B, D)
    assert jnp.allclose(out, ref, atol=1e-5, rtol=1e-5), "mismatch vs reference (small)"

    # --- second test: S-axis reduction (grid_s=2), partial boundary blocks,
    #     megacore TD split (grid_d=2), unpadded embeddings ---
    B2, S2, D2 = 2, 300, 384
    emb2 = jax.random.normal(k_emb2, (B2, S2, D2), dtype=jnp.float32)
    lens = jnp.array([300, 177], dtype=jnp.int32)
    mask2 = (jnp.arange(S2)[None, :] < lens[:, None]).astype(jnp.float32)

    out2 = jax.block_until_ready(splade_pooling(emb2, mask2))
    ref2 = splade_pooling_ref(emb2, mask2)
    assert out2.shape == (B2, D2)
    assert jnp.allclose(out2, ref2, atol=1e-5, rtol=1e-5), "mismatch vs reference (tiled)"

    print("KERNEL_OK")
</pallas_src>

<mosaic_0001>
module attributes {stable_mosaic.version = 11 : i64} {
  func.func @splade_pool_kernel(%arg0: i32, %arg1: i32, %arg2: i32, %arg3: memref<2x8x128xf32, #tpu.memory_space<vmem>>, %arg4: memref<2x8x1xf32, #tpu.memory_space<vmem>>, %arg5: memref<2x128xf32, #tpu.memory_space<vmem>>) attributes {dimension_semantics = [#tpu.dimension_semantics<parallel>, #tpu.dimension_semantics<parallel>, #tpu.dimension_semantics<arbitrary>], iteration_bounds = array<i64: 1, 1, 1>, scalar_prefetch = 0 : i64, scratch_operands = 0 : i64, tpu.core_type = #tpu.core_type<tc>, window_params = [{transform_indices = @transform_0, window_bounds = array<i64: 2, 8, 128>}, {transform_indices = @transform_1, window_bounds = array<i64: 2, 8, 1>}, {transform_indices = @transform_2, window_bounds = array<i64: 2, 128>}]} {
    %c0_i32 = arith.constant 0 : i32
    %0 = arith.cmpi eq, %arg2, %c0_i32 : i32
    %1 = arith.extui %0 : i1 to i32
    %c0_i32_0 = arith.constant 0 : i32
    %2 = arith.cmpi ne, %1, %c0_i32_0 : i32
    scf.if %2 {
      %cst_15 = arith.constant 0.000000e+00 : f32
      %21 = vector.broadcast %cst_15 : f32 to vector<2x128xf32>
      %c0_16 = arith.constant 0 : index
      %c0_17 = arith.constant 0 : index
      %22 = vector.load %arg5[%c0_16, %c0_17] : memref<2x128xf32, #tpu.memory_space<vmem>>, vector<2x128xf32>
      tpu.vector_store %arg5[%c0_16, %c0_17], %21 {strides = array<i32>} : memref<2x128xf32, #tpu.memory_space<vmem>>, vector<2x128xf32>,
    } else {
    }
    %c0 = arith.constant 0 : index
    %c0_1 = arith.constant 0 : index
    %3 = vector.load %arg5[%c0, %c0_1] : memref<2x128xf32, #tpu.memory_space<vmem>>, vector<2x128xf32>
    %c0_2 = arith.constant 0 : index
    %c0_3 = arith.constant 0 : index
    %c0_4 = arith.constant 0 : index
    %4 = vector.load %arg3[%c0_2, %c0_3, %c0_4] : memref<2x8x128xf32, #tpu.memory_space<vmem>>, vector<2x8x128xf32>
    %c0_5 = arith.constant 0 : index
    %c0_6 = arith.constant 0 : index
    %c0_7 = arith.constant 0 : index
    %5 = vector.load %arg4[%c0_5, %c0_6, %c0_7] : memref<2x8x1xf32, #tpu.memory_space<vmem>>, vector<2x8x1xf32>
    %cst = arith.constant 0.000000e+00 : f32
    %6 = vector.broadcast %cst : f32 to vector<2x8x128xf32>
    %7 = arith.maximumf %4, %6 : vector<2x8x128xf32>
    %cst_8 = arith.constant 0.000000e+00 : f32
    %8 = vector.broadcast %cst_8 : f32 to vector<2x8x1xf32>
    %9 = arith.cmpf ogt, %5, %8 : vector<2x8x1xf32>
    %c0_i32_9 = arith.constant 0 : i32
    %10 = arith.sitofp %c0_i32_9 : i32 to f32
    %11 = vector.shape_cast %9 : vector<2x8x1xi1> to vector<2x8x1xi1>
    %12 = vector.broadcast %11 : vector<2x8x1xi1> to vector<2x8x128xi1>
    %13 = vector.broadcast %10 : f32 to vector<2x8x128xf32>
    %14 = arith.select %12, %7, %13 : vector<2x8x128xi1>, vector<2x8x128xf32>
    %cst_10 = arith.constant dense<0xFF800000> : vector<2x128xf32>
    %15 = vector.multi_reduction <maximumf>, %14, %cst_10 [1] : vector<2x8x128xf32> to vector<2x128xf32>
    %16 = arith.maximumf %3, %15 : vector<2x128xf32>
    %c0_11 = arith.constant 0 : index
    %c0_12 = arith.constant 0 : index
    %17 = vector.load %arg5[%c0_11, %c0_12] : memref<2x128xf32, #tpu.memory_space<vmem>>, vector<2x128xf32>
    tpu.vector_store %arg5[%c0_11, %c0_12], %16 {strides = array<i32>} : memref<2x128xf32, #tpu.memory_space<vmem>>, vector<2x128xf32>,
    %c0_i32_13 = arith.constant 0 : i32
    %18 = arith.cmpi eq, %arg2, %c0_i32_13 : i32
    %19 = arith.extui %18 : i1 to i32
    %c0_i32_14 = arith.constant 0 : i32
    %20 = arith.cmpi ne, %19, %c0_i32_14 : i32
    scf.if %20 {
      %c0_15 = arith.constant 0 : index
      %c0_16 = arith.constant 0 : index
      %21 = vector.load %arg5[%c0_15, %c0_16] : memref<2x128xf32, #tpu.memory_space<vmem>>, vector<2x128xf32>
      %22 = math.log1p %21 : vector<2x128xf32>
      %c0_17 = arith.constant 0 : index
      %c0_18 = arith.constant 0 : index
      %23 = vector.load %arg5[%c0_17, %c0_18] : memref<2x128xf32, #tpu.memory_space<vmem>>, vector<2x128xf32>
      tpu.vector_store %arg5[%c0_17, %c0_18], %22 {strides = array<i32>} : memref<2x128xf32, #tpu.memory_space<vmem>>, vector<2x128xf32>,
    } else {
    }
    return
  }
  func.func @transform_0(%arg0: i32, %arg1: i32, %arg2: i32) -> (i32, i32, i32) {
    %c0_i32 = arith.constant 0 : i32
    return %arg0, %arg2, %arg1 : i32, i32, i32
  }
  func.func @transform_1(%arg0: i32, %arg1: i32, %arg2: i32) -> (i32, i32, i32) {
    %c0_i32 = arith.constant 0 : i32
    %c0_i32_0 = arith.constant 0 : i32
    return %arg0, %arg2, %c0_i32 : i32, i32, i32
  }
  func.func @transform_2(%arg0: i32, %arg1: i32, %arg2: i32) -> (i32, i32) {
    %c0_i32 = arith.constant 0 : i32
    return %arg0, %arg1 : i32, i32
  }
}

</mosaic_0001>

<bundles_post_ra>
// kernel: tpu_custom_call.1
= control target key start
LH: loop header
LB: loop body
LE: loop exit
PB: predicated region body
PF: predicated region fallthrough
CT: control target
= control target key end

     0   :  { %s157_s0 = inlined_call_operand.vmem [shape: f32[2,8,128], index: 0, kind: input, shape index: {}]   ;;  %s158_s1 = inlined_call_operand.vmem [shape: f32[2,8,1], index: 1, kind: input, shape index: {}]   ;;  %s159_s2 = inlined_call_operand.hbm [shape: f32[2,128], index: 2, kind: output, shape index: {}]  }
   0x1   :  { %v20_v0 = vld [vmem:[%s158_s1] sm:$0xff]  ;;  %v21_v1 = vld [vmem:[%s158_s1 + $0x8] sm:$0xff] }
   0x2   :  { %7 = vsyncpa [#allocation3], 0  ;;  %v115_v2 = vmov 0   ;;  %vm24_vm0 = vcmp.gt.f32.partialorder %v20_v0, 0.0  ;;  %vm25_vm1 = vcmp.gt.f32.partialorder %v21_v1, 0.0  ;;  %v116_v5 = vmov 0.0  }
   0x3   :  { %88 = vset.pattern.permute.xlu0 %v115_v2  ;;  %v26_v3 = vsel %vm24_vm0, 1, %v115_v2  ;;  %v27_v4 = vsel %vm25_vm1, 1, %v115_v2  ;;  %16 = vst [vmem:[#allocation2] sm:$0x3] %v116_v5  ;;  %v18_v6 = vld [vmem:[%s157_s0] sm:$0xff]  ;;  %v19_v8 = vld [vmem:[%s157_s0 + $0x8] sm:$0xff] }
   0x4   :  { %29 = vperm.xlu0 %88, %v26_v3   ;;  %v22_v7 = vmax.f32 %v18_v6, 0.0  ;;  %v23_v11 = vmax.f32 %v19_v8, 0.0  ;;  %vm52_vm4 = vcmask 1041409   ;;  %s117_s0 = smov [#allocation2]  }
   0x5   :  { %s77_s1 = sshll.u32 %s117_s0, 4  ;;  %s78_s1 = int_to_ptr.vmem [resolvable:$true] %s77_s1 }
   0x6   :  { %s91_s17 = scalar_lea.vmem %s78_s1, 32  ;;  %p96_p1 = scmp.lt.s32.totalorder %s78_s1, %s78_s1 }
   0x7   :  { %p92_p0 = scmp.ne.s32.totalorder %s78_s1, %s91_s17  ;;  %p97_p2 = scmp.lt.s32.totalorder %s91_s17, %s91_s17 }
   0x8   :  { %32 = vperm.xlu0 %88, %v27_v4  }
   0x9   :  { %p98_p3 = por %p97_p2, %p96_p1 }
   0xa   :  { %v17_v26 = vld [vmem:[#allocation2] sm:$0x3] }
   0xb   :  { %p99_p4 = pnand %p98_p3, %p92_p0 }
  0x83   :  { %v30_v9 = vpop.permute.xlu0 %29 }
  0x84   :  { %vm34_vm2 = vcmp.eq.s32.totalorder %v30_v9, 1 }
  0x85   :  { %v36_v10 = vsel %vm34_vm2, %v22_v7, 0.0 }
  0x86   :  { %v38_v12 = vrot.slane %v36_v10, 4 }
  0x87   :  { %v33_v13 = vpop.permute.xlu0 %32 }
  0x88   :  { %v39_v14 = vmax.f32 %v36_v10, %v38_v12  ;;  %vm35_vm3 = vcmp.eq.s32.totalorder %v33_v13, 1 }
  0x89   :  { %v37_v15 = vsel %vm35_vm3, %v23_v11, 0.0 }
  0x8a   :  { %v40_v16 = vrot.slane %v39_v14, 2  ;;  %v44_v17 = vrot.slane %v37_v15, 4 }
  0x8c   :  { %v41_v18 = vmax.f32 %v39_v14, %v40_v16  ;;  %v45_v19 = vmax.f32 %v37_v15, %v44_v17 }
  0x8e   :  { %v46_v20 = vrot.slane %v45_v19, 2  ;;  %v42_v21 = vrot.slane %v41_v18, 1 }
  0x90   :  { %v47_v22 = vmax.f32 %v45_v19, %v46_v20  ;;  %v43_v24 = vmax.f32 %v41_v18, %v42_v21 }
  0x92   :  { %v48_v23 = vrot.slane %v47_v22, 1 }
  0x94   :  { %v49_v25 = vmax.f32 %v47_v22, %v48_v23 }
  0x96   :  { %v53_v27 = vsel %vm52_vm4, %v49_v25, %v43_v24 }
  0x97   :  { %v55_v28 = vmax.f32 %v17_v26, %v53_v27 }
  0x99   :  { %56 = vst [vmem:[#allocation2] sm:$0x3] %v55_v28 }
  0xa0   :  { %v60_v29 = vld [vmem:[#allocation2] sm:$0x3] }
  0xa1   :  { %v61_v30 = vadd.f32 1.0, %v60_v29  ;;  %v64_v31 = vmul.f32 -0.5, %v60_v29  ;;  %v67_v33 = vand.u32 2147483647, %v60_v29 }
  0xa3   :  { %89 = vlog2.f32 %v61_v30  ;;  %v65_v32 = vadd.f32 1.0, %v64_v31  ;;  %vm68_vm5 = vcmp.lt.f32.partialorder %v67_v33, 0.0004427343 }
  0xa5   :  { %v66_v36 = vmul.f32 %v65_v32, %v60_v29 }
  0xad   :  { %v90_v34 = vpop.eup %89 }
  0xae   :  { %v63_v35 = vmul.f32 0.6931472, %v90_v34 }
  0xb0   :  { %v69_v37 = vsel %vm68_vm5, %v66_v36, %v63_v35 }
  0xb1   :  { %70 = vst [vmem:[#allocation2] sm:$0x3] %v69_v37 }
  0xb2   :  { %102 = shalt.err (!%p99_p4)
}
  0xb3   :  { %s103_s20 = scalar_lea.hbm %s159_s2, 32 }
  0xb4   :  { %p104_p5 = scmp.ne.s32.totalorder %s159_s2, %s103_s20  ;;  %p107_p6 = scmp.lt.u32.totalorder %s103_s20, %s159_s2 }
  0xb6   :  { %p109_p7 = pnand %p107_p6, %p104_p5 }
  0xb8   :  { %112 = shalt.err (!%p109_p7)
}
  0xb9   :  { %80 = dma.vmem_to_hbm [thread:$0]  %s78_s1, 32, %s159_s2, [#allocation3]  }
  0xba   :  { %113 = dma.done.wait [#allocation3], 32  }
  0xbb   :  { %114 = vsyncadd [#allocation3], 4294967264 }
  0xbc   :  { %84 = vsyncpa [#allocation3], 1 }

</bundles_post_ra>
